<compile_context>
chip_gen: v6e
topology: v6e:2x2x1
jax: 0.10.0
libtpu: 0.0.40
codegen_flags: <defaults>
</compile_context>

<pallas_src>
import jax
import jax.numpy as jnp
from jax.experimental import pallas as pl
from jax.experimental.pallas import tpu as pltpu


# ----------------------------- Pallas kernel --------------------------------
def traj_encoder_kernel(
    x_ref,               # (TB, D_in)  flattened waypoints for this batch tile
    w1_ref, b1_ref,      # (D_in, H), (1, H)
    w2_ref, b2_ref,      # (H, H),    (1, H)
    w3_ref, b3_ref,      # (H, D_out),(1, D_out)
    o_ref,               # (TB, D_out)
):
    def dense(a, w_ref, b_ref):
        w = w_ref[...]
        # Cast the LHS to the weight dtype (free VPU widen/narrow after the VMEM load);
        # accumulate in f32 on the MXU, bias add in f32.
        acc = jnp.dot(a.astype(w.dtype), w, preferred_element_type=jnp.float32)
        return acc + b_ref[...]

    x = x_ref[...]

    # Linear 1 + LeakyReLU (PyTorch default negative_slope = 0.01)
    h = dense(x, w1_ref, b1_ref)
    h = jnp.maximum(h, 0.01 * h)

    # Linear 2 + LeakyReLU
    h = dense(h, w2_ref, b2_ref)
    h = jnp.maximum(h, 0.01 * h)

    # Linear 3 (output head) — D_out multiple of 128 => lane-dense unmasked store
    out = dense(h, w3_ref, b3_ref)
    o_ref[...] = out.astype(o_ref.dtype)


# --------------------------- tile-size selection ------------------------------
def _choose_tile(B, tile_b):
    """Pick the per-step batch tile.

    - Large tiles to amortize the ~0.35 us per-grid-step overhead (mem-bound kernel).
    - Keep the grid >= 2 whenever B allows, so "parallel" semantics can shard the batch
      axis across both TensorCores on v7x (and megacore on other gens).
    - Tile must be a multiple of 8 (sublane) unless it equals the full batch.
    """
    tile_b = max(8, (tile_b // 8) * 8)
    if B < 16:
        return B                      # single full-array block (always legal)
    half = max(8, (B // 2) // 8 * 8)  # at least 2 tiles when possible
    return min(tile_b, half)


# ------------------------------ wrapper --------------------------------------
def traj_encoder_forward(x, params, *, tile_b=1024, use_bf16=False):
    """x: (B, num_steps, wpt_dim) or (B, num_steps*wpt_dim).  Returns (B, traj_feat_dim) f32."""
    B = x.shape[0]
    xf = x.reshape(B, -1)                       # == x.view(B, num_steps*wpt_dim); no dtype copy
    D_in = xf.shape[1]
    H = params["w1"].shape[1]
    D_out = params["w3"].shape[1]

    w1, w2, w3 = params["w1"], params["w2"], params["w3"]
    b1, b2, b3 = params["b1"], params["b2"], params["b3"]
    if use_bf16:
        # Halve the dominant HBM stream + MXU operand width; accumulation stays f32.
        xf = xf.astype(jnp.bfloat16)
        w1 = w1.astype(jnp.bfloat16)
        w2 = w2.astype(jnp.bfloat16)
        w3 = w3.astype(jnp.bfloat16)

    TB = _choose_tile(B, tile_b)
    grid = (pl.cdiv(B, TB),)                    # no padding: partial edge block is masked

    # Activation stream: tiled along batch, double-buffered by the Pallas pipeline.
    x_spec = pl.BlockSpec((TB, D_in), lambda i: (i, 0))
    out_spec = pl.BlockSpec((TB, D_out), lambda i: (i, 0))

    # Weights / biases: full-array blocks, constant index_map -> VMEM-resident.
    def resident(arr):
        nd = arr.ndim
        return pl.BlockSpec(arr.shape, lambda i, _nd=nd: (0,) * _nd)

    weight_args = (w1, b1, w2, b2, w3, b3)
    in_specs = [x_spec] + [resident(a) for a in weight_args]

    in_elt = jnp.dtype(xf.dtype).itemsize
    w_elt = jnp.dtype(w1.dtype).itemsize

    flops = 2 * B * (D_in * H + H * H + H * D_out)
    bytes_accessed = (
        B * D_in * in_elt + B * D_out * 4                       # activations in/out
        + (D_in * H + H * H + H * D_out) * w_elt                # weights
        + (2 * H + D_out) * 4                                   # biases
    )

    # Explicit scoped-VMEM limit: large TB plus double-buffered streams + f32 activation
    # temporaries can exceed v5e's 16 MiB default. Keep >= 32 MiB, cap at 64 MiB (v7x).
    vmem_est = (
        2 * TB * D_in * in_elt                  # double-buffered x tiles
        + 2 * TB * D_out * 4                    # double-buffered out tiles
        + 2 * (D_in * H + H * H + H * D_out) * w_elt
        + 2 * (2 * H + D_out) * 4
        + 2 * TB * H * 4                        # hidden activation temporaries
    )
    vmem_limit = int(min(64 * 2**20, max(32 * 2**20, 2 * vmem_est)))

    out = pl.pallas_call(
        traj_encoder_kernel,
        out_shape=jax.ShapeDtypeStruct((B, D_out), jnp.float32),
        grid=grid,
        in_specs=in_specs,
        out_specs=out_spec,
        compiler_params=pltpu.CompilerParams(
            dimension_semantics=("parallel",),   # shard batch tiles across TCs
            vmem_limit_bytes=vmem_limit,
        ),
        cost_estimate=pl.CostEstimate(
            flops=flops, transcendentals=0, bytes_accessed=bytes_accessed),
    )(xf, *weight_args)

    return out


# --------------------------- param construction -------------------------------
def init_linear(key, fan_in, fan_out):
    # PyTorch-style uniform(-1/sqrt(fan_in), 1/sqrt(fan_in)); weight stored transposed
    # as (fan_in, fan_out) for x @ W.
    kw, kb = jax.random.split(key)
    bound = 1.0 / jnp.sqrt(fan_in)
    w = jax.random.uniform(kw, (fan_in, fan_out), jnp.float32, -bound, bound)
    b = jax.random.uniform(kb, (1, fan_out), jnp.float32, -bound, bound)
    return w, b


def make_params(key, num_steps, wpt_dim, traj_feat_dim, hidden=256):
    k1, k2, k3 = jax.random.split(key, 3)
    w1, b1 = init_linear(k1, num_steps * wpt_dim, hidden)
    w2, b2 = init_linear(k2, hidden, hidden)
    w3, b3 = init_linear(k3, hidden, traj_feat_dim)
    return dict(w1=w1, b1=b1, w2=w2, b2=b2, w3=w3, b3=b3)


# ------------------------------- reference -----------------------------------
def reference_forward(x, p):
    B = x.shape[0]
    xf = x.reshape(B, -1).astype(jnp.float32)
    h = xf @ p["w1"] + p["b1"]
    h = jnp.where(h > 0, h, 0.01 * h)
    h = h @ p["w2"] + p["b2"]
    h = jnp.where(h > 0, h, 0.01 * h)
    return h @ p["w3"] + p["b3"]


if __name__ == "__main__":
    # Shapes consistent with the module defaults:
    # num_steps=30, wpt_dim=6 -> 180-dim input, hidden=256, traj_feat_dim=128.
    # B=20 deliberately NOT a multiple of the chosen tile so the no-pad partial-block
    # path (masked edge writeback) is exercised: TB=8, grid=(3,), last block 4 rows.
    B = 20
    NUM_STEPS = 30
    WPT_DIM = 6
    TRAJ_FEAT_DIM = 128
    HIDDEN = 256

    key = jax.random.PRNGKey(0)
    k_x, k_params = jax.random.split(key)

    x = jax.random.normal(k_x, (B, NUM_STEPS, WPT_DIM), jnp.float32)
    params = make_params(k_params, NUM_STEPS, WPT_DIM, TRAJ_FEAT_DIM, HIDDEN)
    out_ref = reference_forward(x, params)

    # f32 path: bit-faithful to the PyTorch reference (up to MXU accumulation).
    out = traj_encoder_forward(x, params)
    jax.block_until_ready(out)
    assert out.shape == (B, TRAJ_FEAT_DIM)
    assert jnp.allclose(out, out_ref, atol=1e-5, rtol=1e-5)

    # Optional bf16 MXU-operand path (halves the dominant HBM stream); loose tolerance.
    out_bf16 = traj_encoder_forward(x, params, use_bf16=True)
    jax.block_until_ready(out_bf16)
    assert out_bf16.shape == (B, TRAJ_FEAT_DIM)
    assert jnp.allclose(out_bf16, out_ref, atol=5e-2, rtol=5e-2)

    print("KERNEL_OK")
</pallas_src>

<mosaic_0001>
module attributes {stable_mosaic.version = 11 : i64} {
  func.func @traj_encoder_kernel(%arg0: i32, %arg1: memref<8x180xf32, #tpu.memory_space<vmem>>, %arg2: memref<180x256xf32, #tpu.memory_space<vmem>>, %arg3: memref<1x256xf32, #tpu.memory_space<vmem>>, %arg4: memref<256x256xf32, #tpu.memory_space<vmem>>, %arg5: memref<1x256xf32, #tpu.memory_space<vmem>>, %arg6: memref<256x128xf32, #tpu.memory_space<vmem>>, %arg7: memref<1x128xf32, #tpu.memory_space<vmem>>, %arg8: memref<8x128xf32, #tpu.memory_space<vmem>>) attributes {dimension_semantics = [#tpu.dimension_semantics<parallel>], iteration_bounds = array<i64: 3>, scalar_prefetch = 0 : i64, scratch_operands = 0 : i64, tpu.core_type = #tpu.core_type<tc>, window_params = [{transform_indices = @transform_0, window_bounds = array<i64: 8, 180>}, {pipeline_mode = #tpu.pipeline_mode<synchronous>, transform_indices = @transform_1, window_bounds = array<i64: 180, 256>}, {pipeline_mode = #tpu.pipeline_mode<synchronous>, transform_indices = @transform_2, window_bounds = array<i64: 1, 256>}, {pipeline_mode = #tpu.pipeline_mode<synchronous>, transform_indices = @transform_3, window_bounds = array<i64: 256, 256>}, {pipeline_mode = #tpu.pipeline_mode<synchronous>, transform_indices = @transform_4, window_bounds = array<i64: 1, 256>}, {pipeline_mode = #tpu.pipeline_mode<synchronous>, transform_indices = @transform_5, window_bounds = array<i64: 256, 128>}, {pipeline_mode = #tpu.pipeline_mode<synchronous>, transform_indices = @transform_6, window_bounds = array<i64: 1, 128>}, {transform_indices = @transform_7, window_bounds = array<i64: 8, 128>}]} {
    %c0 = arith.constant 0 : index
    %c0_0 = arith.constant 0 : index
    %0 = vector.load %arg1[%c0, %c0_0] : memref<8x180xf32, #tpu.memory_space<vmem>>, vector<8x180xf32>
    %c0_1 = arith.constant 0 : index
    %c0_2 = arith.constant 0 : index
    %1 = vector.load %arg2[%c0_1, %c0_2] : memref<180x256xf32, #tpu.memory_space<vmem>>, vector<180x256xf32>
    %cst = arith.constant dense<0.000000e+00> : vector<8x256xf32>
    %2 = tpu.matmul %0, %1, %cst {dimension_numbers = #tpu.dot_dimension_numbers<[1], [0], [0], [1], [0, 0, 1, 1], [], []>} : vector<8x180xf32>, vector<180x256xf32>, vector<8x256xf32> -> vector<8x256xf32>
    %c0_3 = arith.constant 0 : index
    %c0_4 = arith.constant 0 : index
    %3 = vector.load %arg3[%c0_3, %c0_4] : memref<1x256xf32, #tpu.memory_space<vmem>>, vector<1x256xf32>
    %4 = vector.broadcast %3 : vector<1x256xf32> to vector<8x256xf32>
    %5 = arith.addf %2, %4 : vector<8x256xf32>
    %cst_5 = arith.constant 0.00999999977 : f32
    %6 = vector.broadcast %cst_5 : f32 to vector<8x256xf32>
    %7 = arith.mulf %6, %5 : vector<8x256xf32>
    %8 = arith.maximumf %5, %7 : vector<8x256xf32>
    %c0_6 = arith.constant 0 : index
    %c0_7 = arith.constant 0 : index
    %9 = vector.load %arg4[%c0_6, %c0_7] : memref<256x256xf32, #tpu.memory_space<vmem>>, vector<256x256xf32>
    %cst_8 = arith.constant dense<0.000000e+00> : vector<8x256xf32>
    %10 = tpu.matmul %8, %9, %cst_8 {dimension_numbers = #tpu.dot_dimension_numbers<[1], [0], [0], [1], [0, 0, 1, 1], [], []>} : vector<8x256xf32>, vector<256x256xf32>, vector<8x256xf32> -> vector<8x256xf32>
    %c0_9 = arith.constant 0 : index
    %c0_10 = arith.constant 0 : index
    %11 = vector.load %arg5[%c0_9, %c0_10] : memref<1x256xf32, #tpu.memory_space<vmem>>, vector<1x256xf32>
    %12 = vector.broadcast %11 : vector<1x256xf32> to vector<8x256xf32>
    %13 = arith.addf %10, %12 : vector<8x256xf32>
    %cst_11 = arith.constant 0.00999999977 : f32
    %14 = vector.broadcast %cst_11 : f32 to vector<8x256xf32>
    %15 = arith.mulf %14, %13 : vector<8x256xf32>
    %16 = arith.maximumf %13, %15 : vector<8x256xf32>
    %c0_12 = arith.constant 0 : index
    %c0_13 = arith.constant 0 : index
    %17 = vector.load %arg6[%c0_12, %c0_13] : memref<256x128xf32, #tpu.memory_space<vmem>>, vector<256x128xf32>
    %cst_14 = arith.constant dense<0.000000e+00> : vector<8x128xf32>
    %18 = tpu.matmul %16, %17, %cst_14 {dimension_numbers = #tpu.dot_dimension_numbers<[1], [0], [0], [1], [0, 0, 1, 1], [], []>} : vector<8x256xf32>, vector<256x128xf32>, vector<8x128xf32> -> vector<8x128xf32>
    %c0_15 = arith.constant 0 : index
    %c0_16 = arith.constant 0 : index
    %19 = vector.load %arg7[%c0_15, %c0_16] : memref<1x128xf32, #tpu.memory_space<vmem>>, vector<1x128xf32>
    %20 = vector.broadcast %19 : vector<1x128xf32> to vector<8x128xf32>
    %21 = arith.addf %18, %20 : vector<8x128xf32>
    %c0_17 = arith.constant 0 : index
    %c0_18 = arith.constant 0 : index
    %22 = vector.load %arg8[%c0_17, %c0_18] : memref<8x128xf32, #tpu.memory_space<vmem>>, vector<8x128xf32>
    tpu.vector_store %arg8[%c0_17, %c0_18], %21 {strides = array<i32>} : memref<8x128xf32, #tpu.memory_space<vmem>>, vector<8x128xf32>,
    return
  }
  func.func @transform_0(%arg0: i32) -> (i32, i32) {
    %c0_i32 = arith.constant 0 : i32
    %c0_i32_0 = arith.constant 0 : i32
    return %arg0, %c0_i32 : i32, i32
  }
  func.func @transform_1(%arg0: i32) -> (i32, i32) {
    %c0_i32 = arith.constant 0 : i32
    %c0_i32_0 = arith.constant 0 : i32
    %c0_i32_1 = arith.constant 0 : i32
    return %c0_i32, %c0_i32_0 : i32, i32
  }
  func.func @transform_2(%arg0: i32) -> (i32, i32) {
    %c0_i32 = arith.constant 0 : i32
    %c0_i32_0 = arith.constant 0 : i32
    %c0_i32_1 = arith.constant 0 : i32
    return %c0_i32, %c0_i32_0 : i32, i32
  }
  func.func @transform_3(%arg0: i32) -> (i32, i32) {
    %c0_i32 = arith.constant 0 : i32
    %c0_i32_0 = arith.constant 0 : i32
    %c0_i32_1 = arith.constant 0 : i32
    return %c0_i32, %c0_i32_0 : i32, i32
  }
  func.func @transform_4(%arg0: i32) -> (i32, i32) {
    %c0_i32 = arith.constant 0 : i32
    %c0_i32_0 = arith.constant 0 : i32
    %c0_i32_1 = arith.constant 0 : i32
    return %c0_i32, %c0_i32_0 : i32, i32
  }
  func.func @transform_5(%arg0: i32) -> (i32, i32) {
    %c0_i32 = arith.constant 0 : i32
    %c0_i32_0 = arith.constant 0 : i32
    %c0_i32_1 = arith.constant 0 : i32
    return %c0_i32, %c0_i32_0 : i32, i32
  }
  func.func @transform_6(%arg0: i32) -> (i32, i32) {
    %c0_i32 = arith.constant 0 : i32
    %c0_i32_0 = arith.constant 0 : i32
    %c0_i32_1 = arith.constant 0 : i32
    return %c0_i32, %c0_i32_0 : i32, i32
  }
  func.func @transform_7(%arg0: i32) -> (i32, i32) {
    %c0_i32 = arith.constant 0 : i32
    %c0_i32_0 = arith.constant 0 : i32
    return %arg0, %c0_i32 : i32, i32
  }
}

</mosaic_0001>

<bundles_post_ra>
// kernel: tpu_custom_call.1
= control target key start
LH: loop header
LB: loop body
LE: loop exit
PB: predicated region body
PF: predicated region fallthrough
CT: control target
= control target key end

     0   :  { %s1417_s0 = inlined_call_operand.hbm [shape: f32[20,180], index: 0, kind: input, shape index: {}]   ;;  %s1418_s1 = inlined_call_operand.hbm [shape: f32[180,256], index: 1, kind: input, shape index: {}]   ;;  %s1419_s2 = inlined_call_operand.vmem [shape: f32[1,256], index: 2, kind: input, shape index: {}]   ;;  %s1420_s3 = inlined_call_operand.hbm [shape: f32[256,256], index: 3, kind: input, shape index: {}]   ;;  %s1421_s4 = inlined_call_operand.vmem [shape: f32[1,256], index: 4, kind: input, shape index: {}]   ;;  %s1422_s5 = inlined_call_operand.hbm [shape: f32[256,128], index: 5, kind: input, shape index: {}]   ;;  %s1423_s6 = inlined_call_operand.vmem [shape: f32[1,128], index: 6, kind: input, shape index: {}]   ;;  %s1424_s7 = inlined_call_operand.hbm [shape: f32[20,128], index: 7, kind: output, shape index: {}]  }
   0x1   :  { %1429 = sst [smem:[#allocation15_spill]] %s1418_s1 }
   0x2   :  { %1430 = sst [smem:[#allocation16_spill]] %s1420_s3 }
   0x3   :  { %12 = vsyncpa [#allocation3], 0 }
   0x4   :  { %14 = vsyncpa [#allocation3 + $0x1], 0 }
   0x5   :  { %15 = vsyncpa [#allocation6], 0 }
   0x6   :  { %16 = vsyncpa [#allocation9], 0 }
   0x7   :  { %17 = vsyncpa [#allocation4], 0 }
   0x8   :  { %19 = vsyncpa [#allocation4 + $0x1], 0  ;;  %s1228_s24 = smov 0   ;;  %s1230_s25 = smov 0  }
   0x9   :  { %s1232_s26 = smov 0   ;;  %s1234_s27 = smov 0  }
   0xa LB: > { %s1249_s28 = sadd.s32 4294967295, %s1177_s27   ;;  %s859_s29 = sadd.s32 4294967294, %s1177_s27   ;;  %s1177_s27 = sphi %s1234_s27, %s1451_s27   ;;  %s1173_s26 = sphi %s1232_s26, %s1450_s26   ;;  %s1169_s25 = sphi %s1230_s25, %s1449_s25   ;;  %s1165_s24 = sphi %s1228_s24, %s1448_s24  }
   0xb   : > { %p45_p0 = scmp.ne.s32.totalorder %s1169_s25, %s1165_s24  ;;  %p1425_p1 = scmp.eq.s32.totalorder %s1249_s28, 0 }
   0xc   : > { %p201_p3 = scmp.eq.s32.totalorder %s859_s29, 2  ;;  %p860_p5 = scmp.ge.s32.totalorder %s1177_s27, 1 }
   0xd   : > { %p1258_p4 = por %p1425_p1, %p45_p0  ;;  %p208_p7 = scmp.lt.s32.totalorder %s1177_s27, 4 }
   0xe   : > { %p1263_p6 = por %p201_p3, %p45_p0  ;;  %s1179_s10 = smov [#allocation5]  }
   0xf   : > { %s1431_s30 = scalar_select %p1258_p4, 1, 0 }
  0x10   : > { %s1432_s8 = scalar_select %p1263_p6, 1, 0 }
  0x11   : > { %p1268_p8 = pnand %p860_p5, %p208_p7  ;;  %s220_s11 = sshll.u32 %s1179_s10, 4  ;;  %s221_s11 = int_to_ptr.vmem [resolvable:$true] %s220_s11 }
  0x12   : > { %s1180_s13 = smov [#allocation7]   ;;  %s1181_s15 = smov [#allocation8]  }
  0x13   : > { %s1433_s9 = scalar_select %p1268_p8, 1, 0 }
  0x14   : > { %p934_p9 = pneg %p1268_p8  ;;  %s236_s14 = sshll.u32 %s1180_s13, 4  ;;  %s237_s14 = int_to_ptr.vmem [resolvable:$true] %s236_s14 }
  0x15   : > { %s252_s16 = sshll.u32 %s1181_s15, 4  ;;  %s1010_s17 = scalar_lea.vmem %s221_s11, 5888  ;;  %s253_s16 = int_to_ptr.vmem [resolvable:$true] %s252_s16 }
  0x16   : > { %p1276_p10 = pnand %p934_p9, %p1425_p1  ;;  %p1011_p12 = scmp.ne.s32.totalorder %s221_s11, %s1010_s17 }
  0x17   : > { %p1018_p3 = scmp.lt.s32.totalorder %s221_s11, %s221_s11  ;;  %p1019_p5 = scmp.lt.s32.totalorder %s1010_s17, %s1010_s17 }
  0x18   : > { %p1001_p11 = pneg %p1276_p10 }
  0x19   : > { %p1020_p7 = por %p1019_p5, %p1018_p3 }
  0x1a   : > { %p1013_p13 = pnand %p1011_p12, %p1001_p11 }
  0x1c   : > { %p1014_p0 = pneg %p1013_p13 }
  0x1e   : > { %p1021_p9 = pnand %p1020_p7, %p1014_p0 }
  0x20   : > { %1024 = shalt.err (!%p1021_p9)
}
  0x21   : > { %s1182_s18 = smov 256   ;;  %s1183_s19 = smov 16  }
  0x22   : > { %s1435_s1 = sld [smem:[#allocation15_spill]]  ;;  %s1036_s22 = scalar_lea.vmem %s237_s14, 8192 }
  0x23   : > { %p1037_p1 = scmp.ne.s32.totalorder %s237_s14, %s1036_s22  ;;  %p1044_p2 = scmp.lt.s32.totalorder %s237_s14, %s237_s14 }
  0x24   : > { %p1045_p6 = scmp.lt.s32.totalorder %s1036_s22, %s1036_s22 }
  0x25   : > { %p1039_p12 = pnand %p1037_p1, %p1001_p11 }
  0x26   : > { %p1046_p3 = por %p1045_p6, %p1044_p2 }
  0x27   : > { %p1040_p13 = pneg %p1039_p12 }
  0x28   : > { %937 = dma.hbm_to_vmem [thread:$0]  (!%p1276_p10), %s1435_s1, 5888, %s221_s11, [#allocation6], %s1182_s18, %s1182_s18, %s1183_s19  }
  0x29   : > { %p1047_p0 = pnand %p1046_p3, %p1040_p13 }
  0x2b   : > { %1050 = shalt.err (!%p1047_p0)
}
  0x2c   : > { %s1436_s3 = sld [smem:[#allocation16_spill]]  ;;  %s1062_s10 = scalar_lea.vmem %s253_s16, 4096 }
  0x2d   : > { %p1063_p5 = scmp.ne.s32.totalorder %s253_s16, %s1062_s10  ;;  %p1070_p9 = scmp.lt.s32.totalorder %s253_s16, %s253_s16 }
  0x2e   : > { %p1071_p12 = scmp.lt.s32.totalorder %s1062_s10, %s1062_s10 }
  0x2f   : > { %p1065_p7 = pnand %p1063_p5, %p1001_p11 }
  0x30   : > { %p1072_p4 = por %p1071_p12, %p1070_p9 }
  0x31   : > { %p1066_p1 = pneg %p1065_p7 }
  0x32   : > { %940 = dma.hbm_to_vmem [thread:$0]  (!%p1276_p10), %s1436_s3, 8192, %s237_s14, [#allocation6], %s1182_s18, %s1182_s18, %s1183_s19  }
  0x33   : > { %p1073_p2 = pnand %p1072_p4, %p1066_p1 }
  0x35   : > { %1076 = shalt.err (!%p1073_p2)
}
  0x36   : > { %s1184_s11 = smov 128   ;;  %s1185_s13 = smov 8  }
  0x37   : > { %943 = dma.hbm_to_vmem [thread:$0]  (!%p1276_p10), %s1422_s5, 4096, %s253_s16, [#allocation9], %s1184_s11, %s1184_s11, %s1185_s13  }
  0x38   : > { %s1307_s17 = sadd.s32 1, %s1177_s27   ;;  %s32_s19 = sadd.s32 1, %s1173_s26 }
  0x39   : > { %s29_s18 = ssub.s32 %s1177_s27, %s1307_s17  ;;  %p39_p6 = scmp.ne.s32.totalorder %s1173_s26, %s1169_s25 }
  0x3a   : > { %p30_p4 = scmp.eq.s32.totalorder %s29_s18, 0  ;;  %p40_p11 = scmp.eq.s32.totalorder %s1177_s27, 0 }
  0x3b   : > { %p955_p13 = scmp.lt.s32.totalorder %s1177_s27, 3  ;;  %p1437_p0 = scmp.eq.s32.totalorder %s1249_s28, 2 }
  0x3c   : > { %s1317_s20 = scalar_select %p30_p4, %s1173_s26, %s32_s19  }
  0x3d   : > { %p41_p3 = por %p40_p11, %p39_p6  ;;  %p1321_p5 = por %p1437_p0, %p39_p6 }
  0x3e   : > { %s269_s12 = sand.u32 1, %s1173_s26   ;;  %s882_s22 = sshll.u32 %s1177_s27, 8 }
  0x3f   : > { %s1438_s21 = scalar_select %p1321_p5, 1, 0 }
  0x40   : > { %s865_s16 = sshll.u32 %s269_s12, 4  ;;  %s1330_s10 = scalar_lea.hbm %s1417_s0, %s882_s22 }
  0x41   : > { %s273_s11 = scalar_lea.vmem [#allocation2], %s865_s16  ;;  %p1332_p10 = pnand %p955_p13, %p41_p3 }
  0x42   : > { %s281_s13 = sshll.u32 %s273_s11, 4  ;;  %s270_s15 = scalar_lea.sflag [#allocation3], %s269_s12  ;;  %s282_s13 = int_to_ptr.vmem [resolvable:$true] %s281_s13 }
  0x43   : > { %s1077_s18 = scalar_lea.hbm %s1330_s10, 256  ;;  %p1079_p1 = pneg %p1332_p10 }
  0x44   : > { %p1078_p7 = scmp.ne.s32.totalorder %s1330_s10, %s1077_s18  ;;  %s1082_s23 = scalar_lea.hbm %s1417_s0, 768 }
  0x45   : > { %p1083_p2 = scmp.lt.s32.totalorder %s1330_s10, %s1417_s0  ;;  %p1084_p4 = scmp.lt.s32.totalorder %s1082_s23, %s1077_s18 }
  0x46   : > { %p1080_p9 = pnand %p1079_p1, %p1078_p7 }
  0x47   : > { %p1085_p6 = por %p1084_p4, %p1083_p2 }
  0x48   : > { %p1081_p12 = pneg %p1080_p9 }
  0x4a   : > { %p1086_p11 = pnand %p1085_p6, %p1081_p12 }
  0x4c   : > { %1089 = shalt.err (!%p1086_p11)
}
  0x4d   : > { %s1090_s11 = scalar_lea.vmem %s282_s13, 256  ;;  %s1186_s12 = smov [#allocation2]  }
  0x4e   : > { %p1091_p13 = scmp.ne.s32.totalorder %s282_s13, %s1090_s11  ;;  %s1095_s1 = sshll.u32 %s1186_s12, 4  ;;  %s1096_s1 = int_to_ptr.vmem [resolvable:$false] %s1095_s1 }
  0x4f   : > { %s1097_s3 = scalar_lea.vmem %s1096_s1, 512  ;;  %p1098_p7 = scmp.lt.s32.totalorder %s282_s13, %s1096_s1 }
  0x50   : > { %p1093_p3 = pnand %p1091_p13, %p1079_p1  ;;  %p1099_p9 = scmp.lt.s32.totalorder %s1097_s3, %s1090_s11 }
  0x52   : > { %p1094_p0 = pneg %p1093_p3  ;;  %p1100_p5 = por %p1099_p9, %p1098_p7 }
  0x54   : > { %p1101_p8 = pnand %p1100_p5, %p1094_p0 }
  0x56   : > { %1104 = shalt.err (!%p1101_p8)
}
  0x57   : > { %947 = dma.hbm_to_vmem [thread:$0]  (!%p1332_p10), %s1330_s10, 256, %s282_s13, %s270_s15  }
  0x58   : > { %p1440_p12 = scmp.ne.s32.totalorder %s1433_s9, 0 }
  0x59   : > { %s1353_s18 = sand.u32 (!%p1440_p12), 1, %s1169_s25   ;;  %p1441_p1 = scmp.ne.s32.totalorder (!%p1440_p12), %s1431_s30, 0 }
  0x5a   : > { %290 = sbr.rel (%p1440_p12) target bundleno = 766 (0x2fe), region = 48  ;;  %s869_s19 = sshll.u32 (!%p1440_p12), %s1353_s18, 4 }
  0x5b   : > { %s293_s22 = scalar_lea.sflag (!%p1440_p12), [#allocation3], %s1353_s18  ;;  %s1357_s1 = scalar_lea.vmem (!%p1440_p12), [#allocation2], %s869_s19 }
  0x5f   : > { %1148 = dma.done.wait (%p1441_p1), %s293_s22, 256  }
  0x60   : > { %1150 = vsyncadd (%p1441_p1), %s293_s22, 4294967040  ;;  %p1442_p8 = scmp.eq.s32.totalorder %s1249_s28, 0 }
  0x62   : > { %1152 = dma.done.wait (%p1442_p8), [#allocation6], 14080   ;;  %p1443_p5 = pmov %p1442_p8 }
  0x64   : > { %1154 = vsyncadd (%p1443_p5), [#allocation6], 4294953216  ;;  %p1444_p10 = pmov %p1443_p5 }
  0x65   : > { %p1445_p2 = pmov %p1443_p5 }
  0x66   : > { %1156 = dma.done.wait (%p1444_p10), [#allocation9], 4096  }
  0x67   : > { %1158 = vsyncadd (%p1445_p2), [#allocation9], 4294963200  ;;  %v372_v0 = vld [vmem:[#allocation5 + $0xf8] sm:$0xff]  ;;  %v371_v1 = vld [vmem:[#allocation5 + $0xf0] sm:$0xff]  ;;  %vm399_vm0 = vcmask 424960   ;;  %vm403_vm1 = vcmask 1043456  }
  0x68   : > { %v370_v2 = vld [vmem:[#allocation5 + $0xe8] sm:$0xff]  ;;  %410 = vmatprep.subr.mxu0 %v372_v0  ;;  %v369_v3 = vld [vmem:[#allocation5 + $0xe0] sm:$0xff]  ;;  %v368_v4 = vld [vmem:[#allocation5 + $0xd8] sm:$0xff]  ;;  %s873_s13 = sshll.u32 %s1353_s18, 3  ;;  %s879_s23 = sshll.u32 %s1249_s28, 7 }
  0x69   : > { %411 = vmatpush1.msra.mxu0 %v371_v1  ;;  %v367_v5 = vld [vmem:[#allocation5 + $0xd0] sm:$0xff]  ;;  %v366_v6 = vld [vmem:[#allocation5 + $0xc8] sm:$0xff]  ;;  %v365_v7 = vld [vmem:[#allocation5 + $0xc0] sm:$0xff]  ;;  %s338_s29 = scalar_lea.vmem [#allocation10], %s873_s13  ;;  %s758_s19 = scalar_lea.hbm %s1424_s7, %s879_s23 }
  0x6a   : > { %412 = vmatprep.subr.mxu0 %v370_v2  ;;  %v364_v8 = vld [vmem:[#allocation5 + $0xb8] sm:$0xff]  ;;  %v363_v9 = vld [vmem:[#allocation5 + $0xb0] sm:$0xff]  ;;  %v362_v10 = vld [vmem:[#allocation5 + $0xa8] sm:$0xff]  ;;  %s760_s16 = sshll.u32 %s338_s29, 4  ;;  %s747_s22 = scalar_lea.sflag [#allocation4], %s1353_s18  ;;  %s761_s16 = int_to_ptr.vmem [resolvable:$true] %s760_s16 }
  0x6b   : > { %413 = vmatpush1.msra.mxu0 %v369_v3  ;;  %v361_v11 = vld [vmem:[#allocation5 + $0xa0] sm:$0xff]  ;;  %v360_v12 = vld [vmem:[#allocation5 + $0x98] sm:$0xff]  ;;  %v359_v13 = vld [vmem:[#allocation5 + $0x90] sm:$0xff]  ;;  %p1446_p6 = scmp.ne.s32.totalorder %s1438_s21, 0  ;;  %s1187_s3 = smov [#allocation10]  }
  0x6c   : > { %414 = vmatprep.subr.mxu0 %v368_v4  ;;  %v358_v14 = vld [vmem:[#allocation5 + $0x88] sm:$0xff]  ;;  %v357_v15 = vld [vmem:[#allocation5 + $0x80] sm:$0xff]  ;;  %v356_v16 = vld [vmem:[#allocation5 + $0x78] sm:$0xff]  ;;  %s1109_s30 = sshll.u32 %s1187_s3, 4  ;;  %s1110_s30 = int_to_ptr.vmem [resolvable:$false] %s1109_s30 }
  0x6d   : > { %415 = vmatpush1.msra.mxu0 %v367_v5  ;;  %v355_v17 = vld [vmem:[#allocation5 + $0x70] sm:$0xff]  ;;  %v354_v18 = vld [vmem:[#allocation5 + $0x68] sm:$0xff]  ;;  %v515_v21 = vld [vmem:[#allocation7 + $0xf0] sm:$0xff]  ;;  %s1111_s28 = scalar_lea.vmem %s1110_s30, 256  ;;  %p1112_p3 = scmp.lt.s32.totalorder %s761_s16, %s1110_s30 }
  0x6e   : > { %416 = vmatprep.subr.mxu0 %v366_v6  ;;  %v340_v19 = vld [vmem:[%s1357_s1 + $0x8] sm:$0xff]  ;;  %v353_v23 = vld [vmem:[#allocation5 + $0x60] sm:$0xff]  ;;  %v513_v24 = vld [vmem:[#allocation7 + $0xe0] sm:$0xff] }
  0x6f   : > { %417 = vmatpush1.msra.mxu0 %v365_v7  ;;  %876 = vmatprep.mubr.msk.f32.mxu0 %vm399_vm0, %v340_v19  ;;  %v516_v20 = vld [vmem:[#allocation7 + $0xf8] sm:$0xff]  ;;  %v514_v22 = vld [vmem:[#allocation7 + $0xe8] sm:$0xff]  ;;  %v351_v27 = vld [vmem:[#allocation5 + $0x50] sm:$0xff] }
  0x70   : > { %418 = vmatprep.subr.mxu0 %v364_v8  ;;  %561 = vmatprep.subr.mxu1 %v516_v20  ;;  %v352_v25 = vld [vmem:[#allocation5 + $0x58] sm:$0xff]  ;;  %v512_v26 = vld [vmem:[#allocation7 + $0xd8] sm:$0xff]  ;;  %v511_v28 = vld [vmem:[#allocation7 + $0xd0] sm:$0xff] }
  0x71   : > { %419 = vmatpush1.msra.mxu0 %v363_v9  ;;  %562 = vmatpush1.msra.mxu1 %v515_v21  ;;  %v350_v29 = vld [vmem:[#allocation5 + $0x48] sm:$0xff]  ;;  %v510_v30 = vld [vmem:[#allocation7 + $0xc8] sm:$0xff]  ;;  %v349_v31 = vld [vmem:[#allocation5 + $0x40] sm:$0xff] }
  0x72   : > { %420 = vmatprep.subr.mxu0 %v362_v10  ;;  %563 = vmatprep.subr.mxu1 %v514_v22  ;;  %v509_v32 = vld [vmem:[#allocation7 + $0xc0] sm:$0xff]  ;;  %v348_v33 = vld [vmem:[#allocation5 + $0x38] sm:$0xff]  ;;  %v508_v34 = vld [vmem:[#allocation7 + $0xb8] sm:$0xff] }
  0x73   : > { %421 = vmatpush1.msra.mxu0 %v361_v11  ;;  %564 = vmatpush1.msra.mxu1 %v513_v24  ;;  %v347_v35 = vld [vmem:[#allocation5 + $0x30] sm:$0xff]  ;;  %v507_v36 = vld [vmem:[#allocation7 + $0xb0] sm:$0xff]  ;;  %v346_v37 = vld [vmem:[#allocation5 + $0x28] sm:$0xff] }
  0x74   : > { %422 = vmatprep.subr.mxu0 %v360_v12  ;;  %565 = vmatprep.subr.mxu1 %v512_v26  ;;  %v506_v38 = vld [vmem:[#allocation7 + $0xa8] sm:$0xff]  ;;  %v345_v39 = vld [vmem:[#allocation5 + $0x20] sm:$0xff]  ;;  %v505_v40 = vld [vmem:[#allocation7 + $0xa0] sm:$0xff] }
  0x75   : > { %423 = vmatpush1.msra.mxu0 %v359_v13  ;;  %566 = vmatpush1.msra.mxu1 %v511_v28  ;;  %v344_v41 = vld [vmem:[#allocation5 + $0x18] sm:$0xff]  ;;  %v504_v42 = vld [vmem:[#allocation7 + $0x98] sm:$0xff]  ;;  %v343_v43 = vld [vmem:[#allocation5 + $0x10] sm:$0xff] }
  0x76   : > { %424 = vmatprep.subr.mxu0 %v358_v14  ;;  %567 = vmatprep.subr.mxu1 %v510_v30  ;;  %v503_v44 = vld [vmem:[#allocation7 + $0x90] sm:$0xff]  ;;  %v342_v45 = vld [vmem:[#allocation5 + $0x8] sm:$0xff]  ;;  %v502_v46 = vld [vmem:[#allocation7 + $0x88] sm:$0xff] }
  0x77   : > { %425 = vmatpush1.msra.mxu0 %v357_v15  ;;  %568 = vmatpush1.msra.mxu1 %v509_v32  ;;  %v341_v47 = vld [vmem:[#allocation5] sm:$0xff]  ;;  %v501_v48 = vld [vmem:[#allocation7 + $0x80] sm:$0xff]  ;;  %v386_v49 = vld [vmem:[#allocation5 + $0x168] sm:$0xf] }
  0x78   : > { %426 = vmatprep.subr.mxu0 %v356_v16  ;;  %569 = vmatprep.subr.mxu1 %v508_v34  ;;  %v500_v50 = vld [vmem:[#allocation7 + $0x78] sm:$0xff]  ;;  %v385_v51 = vld [vmem:[#allocation5 + $0x160] sm:$0xf]  ;;  %v384_v53 = vld [vmem:[#allocation5 + $0x158] sm:$0xff] }
  0x79   : > { %427 = vmatpush1.msra.mxu0 %v355_v17  ;;  %570 = vmatpush1.msra.mxu1 %v507_v36  ;;  %v499_v52 = vld [vmem:[#allocation7 + $0x70] sm:$0xff]  ;;  %v498_v54 = vld [vmem:[#allocation7 + $0x68] sm:$0xff]  ;;  %v383_v55 = vld [vmem:[#allocation5 + $0x150] sm:$0xff] }
  0x7a   : > { %428 = vmatprep.subr.mxu0 %v354_v18  ;;  %571 = vmatprep.subr.mxu1 %v506_v38  ;;  %v497_v56 = vld [vmem:[#allocation7 + $0x60] sm:$0xff]  ;;  %v382_v57 = vld [vmem:[#allocation5 + $0x148] sm:$0xff]  ;;  %v381_v59 = vld [vmem:[#allocation5 + $0x140] sm:$0xff] }
  0x7b   : > { %429 = vmatpush1.msra.mxu0 %v353_v23  ;;  %572 = vmatpush1.msra.mxu1 %v505_v40  ;;  %v496_v58 = vld [vmem:[#allocation7 + $0x58] sm:$0xff]  ;;  %v495_v60 = vld [vmem:[#allocation7 + $0x50] sm:$0xff]  ;;  %v380_v61 = vld [vmem:[#allocation5 + $0x138] sm:$0xff] }
  0x7c   : > { %430 = vmatprep.subr.mxu0 %v352_v25  ;;  %573 = vmatprep.subr.mxu1 %v504_v42  ;;  %v494_v62 = vld [vmem:[#allocation7 + $0x48] sm:$0xff]  ;;  %v379_v63 = vld [vmem:[#allocation5 + $0x130] sm:$0xff]  ;;  %v378_v1 = vld [vmem:[#allocation5 + $0x128] sm:$0xff] }
  0x7d   : > { %431 = vmatpush1.msra.mxu0 %v351_v27  ;;  %574 = vmatpush1.msra.mxu1 %v503_v44  ;;  %v493_v0 = vld [vmem:[#allocation7 + $0x40] sm:$0xff]  ;;  %v492_v2 = vld [vmem:[#allocation7 + $0x38] sm:$0xff]  ;;  %v377_v3 = vld [vmem:[#allocation5 + $0x120] sm:$0xff] }
  0x7e   : > { %432 = vmatprep.subr.mxu0 %v350_v29  ;;  %575 = vmatprep.subr.mxu1 %v502_v46  ;;  %v491_v4 = vld [vmem:[#allocation7 + $0x30] sm:$0xff]  ;;  %v376_v5 = vld [vmem:[#allocation5 + $0x118] sm:$0xff]  ;;  %v375_v7 = vld [vmem:[#allocation5 + $0x110] sm:$0xff] }
  0x7f   : > { %433 = vmatpush1.msra.mxu0 %v349_v31  ;;  %576 = vmatpush1.msra.mxu1 %v501_v48  ;;  %v490_v6 = vld [vmem:[#allocation7 + $0x28] sm:$0xff]  ;;  %v489_v8 = vld [vmem:[#allocation7 + $0x20] sm:$0xff]  ;;  %v374_v9 = vld [vmem:[#allocation5 + $0x108] sm:$0xff] }
  0x80   : > { %434 = vmatprep.subr.mxu0 %v348_v33  ;;  %577 = vmatprep.subr.mxu1 %v500_v50  ;;  %v488_v10 = vld [vmem:[#allocation7 + $0x18] sm:$0xff]  ;;  %v373_v11 = vld [vmem:[#allocation5 + $0x100] sm:$0xff]  ;;  %v486_v14 = vld [vmem:[#allocation7 + $0x8] sm:$0xff] }
  0x81   : > { %435 = vmatpush1.msra.mxu0 %v347_v35  ;;  %578 = vmatpush1.msra.mxu1 %v499_v52  ;;  %v487_v12 = vld [vmem:[#allocation7 + $0x10] sm:$0xff]  ;;  %v485_v15 = vld [vmem:[#allocation7] sm:$0xff]  ;;  %v548_v16 = vld [vmem:[#allocation7 + $0x1f8] sm:$0xff] }
  0x82   : > { %436 = vmatprep.subr.mxu0 %v346_v37  ;;  %579 = vmatprep.subr.mxu1 %v498_v54  ;;  %v339_v13 = vld [vmem:[%s1357_s1] sm:$0xff]  ;;  %v546_v18 = vld [vmem:[#allocation7 + $0x1e8] sm:$0xff]  ;;  %v544_v20 = vld [vmem:[#allocation7 + $0x1d8] sm:$0xff]  ;;  %s1105_s1 = scalar_lea.vmem %s761_s16, 128 }
  0x83   : > { %437 = vmatpush1.msra.mxu0 %v345_v39  ;;  %580 = vmatpush1.msra.mxu1 %v497_v56  ;;  %v547_v17 = vld [vmem:[#allocation7 + $0x1f0] sm:$0xff]  ;;  %v545_v19 = vld [vmem:[#allocation7 + $0x1e0] sm:$0xff]  ;;  %v542_v22 = vld [vmem:[#allocation7 + $0x1c8] sm:$0xff]  ;;  %p1106_p4 = scmp.ne.s32.totalorder %s761_s16, %s1105_s1  ;;  %p1113_p0 = scmp.lt.s32.totalorder %s1111_s28, %s1105_s1 }
  0x84   : > { %438 = vmatprep.subr.mxu0 %v344_v41  ;;  %581 = vmatprep.subr.mxu1 %v496_v58  ;;  %v543_v21 = vld [vmem:[#allocation7 + $0x1d0] sm:$0xff]  ;;  %v541_v23 = vld [vmem:[#allocation7 + $0x1c0] sm:$0xff]  ;;  %v540_v24 = vld [vmem:[#allocation7 + $0x1b8] sm:$0xff] }
  0x85   : > { %439 = vmatpush1.msra.mxu0 %v343_v43  ;;  %582 = vmatpush1.msra.mxu1 %v495_v60  ;;  %v539_v25 = vld [vmem:[#allocation7 + $0x1b0] sm:$0xff]  ;;  %v538_v26 = vld [vmem:[#allocation7 + $0x1a8] sm:$0xff]  ;;  %v537_v27 = vld [vmem:[#allocation7 + $0x1a0] sm:$0xff]  ;;  %p1107_p11 = pnand %p1106_p4, %p1446_p6  ;;  %p1114_p7 = por %p1113_p0, %p1112_p3 }
  0x86   : > { %440 = vmatprep.subr.mxu0 %v342_v45  ;;  %583 = vmatprep.subr.mxu1 %v494_v62  ;;  %v536_v28 = vld [vmem:[#allocation7 + $0x198] sm:$0xff]  ;;  %v535_v29 = vld [vmem:[#allocation7 + $0x190] sm:$0xff]  ;;  %v534_v30 = vld [vmem:[#allocation7 + $0x188] sm:$0xff] }
  0x87   : > { %441 = vmatpush1.msra.mxu0 %v341_v47  ;;  %584 = vmatpush1.msra.mxu1 %v493_v0  ;;  %v533_v31 = vld [vmem:[#allocation7 + $0x180] sm:$0xff]  ;;  %v532_v32 = vld [vmem:[#allocation7 + $0x178] sm:$0xff]  ;;  %v531_v33 = vld [vmem:[#allocation7 + $0x170] sm:$0xff]  ;;  %p1108_p13 = pneg %p1107_p11 }
  0x88   : > { %874 = vmatprep.subr.msk.mxu0 %vm403_vm1, %v386_v49  ;;  %585 = vmatprep.subr.mxu1 %v492_v2  ;;  %v530_v34 = vld [vmem:[#allocation7 + $0x168] sm:$0xff]  ;;  %v529_v35 = vld [vmem:[#allocation7 + $0x160] sm:$0xff]  ;;  %v528_v36 = vld [vmem:[#allocation7 + $0x158] sm:$0xff] }
  0x89   : > { %875 = vmatpush2.msk.msra.mxu0 %vm403_vm1, %v385_v51  ;;  %586 = vmatpush1.msra.mxu1 %v491_v4  ;;  %v527_v37 = vld [vmem:[#allocation7 + $0x150] sm:$0xff]  ;;  %v526_v38 = vld [vmem:[#allocation7 + $0x148] sm:$0xff]  ;;  %v525_v39 = vld [vmem:[#allocation7 + $0x140] sm:$0xff]  ;;  %p1115_p9 = pnand %p1114_p7, %p1108_p13 }
  0x8a   : > { %462 = vmatprep.subr.mxu0 %v384_v53  ;;  %587 = vmatprep.subr.mxu1 %v490_v6  ;;  %v524_v40 = vld [vmem:[#allocation7 + $0x138] sm:$0xff]  ;;  %v523_v41 = vld [vmem:[#allocation7 + $0x130] sm:$0xff]  ;;  %v522_v42 = vld [vmem:[#allocation7 + $0x128] sm:$0xff]  ;;  %v389_v6 = vlaneseq }
  0x8b   : > { %463 = vmatpush2.msra.mxu0 %v383_v55  ;;  %588 = vmatpush1.msra.mxu1 %v489_v8  ;;  %v521_v43 = vld [vmem:[#allocation7 + $0x120] sm:$0xff]  ;;  %v520_v44 = vld [vmem:[#allocation7 + $0x118] sm:$0xff]  ;;  %v519_v45 = vld [vmem:[#allocation7 + $0x110] sm:$0xff] }
  0x8c   : > { %464 = vmatprep.subr.mxu0 %v382_v57  ;;  %589 = vmatprep.subr.mxu1 %v488_v10  ;;  %v518_v46 = vld [vmem:[#allocation7 + $0x108] sm:$0xff]  ;;  %v517_v47 = vld [vmem:[#allocation7 + $0x100] sm:$0xff]  ;;  %v667_v48 = vld [vmem:[#allocation8 + $0xf8] sm:$0xff] }
  0x8d   : > { %465 = vmatpush2.msra.mxu0 %v381_v59  ;;  %590 = vmatpush1.msra.mxu1 %v487_v12  ;;  %v651_v49 = vld [vmem:[#allocation8 + $0x78] sm:$0xff]  ;;  %v666_v50 = vld [vmem:[#allocation8 + $0xf0] sm:$0xff]  ;;  %v665_v52 = vld [vmem:[#allocation8 + $0xe8] sm:$0xff] }
  0x8e   : > { %466 = vmatprep.subr.mxu0 %v380_v61  ;;  %591 = vmatprep.subr.mxu1 %v486_v14  ;;  %v650_v51 = vld [vmem:[#allocation8 + $0x70] sm:$0xff]  ;;  %v649_v53 = vld [vmem:[#allocation8 + $0x68] sm:$0xff]  ;;  %v664_v54 = vld [vmem:[#allocation8 + $0xe0] sm:$0xff] }
  0x8f   : > { %467 = vmatpush2.msra.mxu0 %v379_v63  ;;  %592 = vmatpush1.msra.mxu1 %v485_v15  ;;  %v648_v55 = vld [vmem:[#allocation8 + $0x60] sm:$0xff]  ;;  %v663_v56 = vld [vmem:[#allocation8 + $0xd8] sm:$0xff]  ;;  %v662_v58 = vld [vmem:[#allocation8 + $0xd0] sm:$0xff] }
  0x90   : > { %468 = vmatprep.subr.mxu0 %v378_v1  ;;  %593 = vmatprep.subr.mxu1 %v548_v16  ;;  %v647_v57 = vld [vmem:[#allocation8 + $0x58] sm:$0xff]  ;;  %v646_v59 = vld [vmem:[#allocation8 + $0x50] sm:$0xff]  ;;  %v661_v60 = vld [vmem:[#allocation8 + $0xc8] sm:$0xff] }
  0x91   : > { %469 = vmatpush2.msra.mxu0 %v377_v3  ;;  %594 = vmatpush2.msra.mxu1 %v547_v17  ;;  %v645_v61 = vld [vmem:[#allocation8 + $0x48] sm:$0xff]  ;;  %v660_v62 = vld [vmem:[#allocation8 + $0xc0] sm:$0xff]  ;;  %v659_v0 = vld [vmem:[#allocation8 + $0xb8] sm:$0xff] }
  0x92   : > { %470 = vmatprep.subr.mxu0 %v376_v5  ;;  %595 = vmatprep.subr.mxu1 %v546_v18  ;;  %v644_v63 = vld [vmem:[#allocation8 + $0x40] sm:$0xff]  ;;  %v643_v1 = vld [vmem:[#allocation8 + $0x38] sm:$0xff]  ;;  %v658_v2 = vld [vmem:[#allocation8 + $0xb0] sm:$0xff] }
  0x93   : > { %471 = vmatpush2.msra.mxu0 %v375_v7  ;;  %596 = vmatpush2.msra.mxu1 %v545_v19  ;;  %v642_v3 = vld [vmem:[#allocation8 + $0x30] sm:$0xff]  ;;  %v657_v4 = vld [vmem:[#allocation8 + $0xa8] sm:$0xff]  ;;  %v390_v7 = vshrl.u32 %v389_v6, 7 }
  0x94   : > { %472 = vmatprep.subr.mxu0 %v374_v9  ;;  %597 = vmatprep.subr.mxu1 %v544_v20  ;;  %v641_v5 = vld [vmem:[#allocation8 + $0x28] sm:$0xff]  ;;  %v387_v9 = vld [vmem:[%s1419_s2] sm:$0x3] }
  0x95   : > { %473 = vmatpush2.msra.mxu0 %v373_v11  ;;  %598 = vmatpush2.msra.mxu1 %v543_v21  ;;  %v391_v8 = vsub.s32 0, %v390_v7  ;;  %v395_v10 = vsub.s32 1, %v390_v7  ;;  %v656_v21 = vld [vmem:[#allocation8 + $0xa0] sm:$0xff] }
  0x96   : > { %475 = vmatmul.mubr.f32.vlgmr.msra.gmra.mxu0 %v339_v13  ;;  %599 = vmatprep.subr.mxu1 %v542_v22  ;;  %v640_v22 = vld [vmem:[#allocation8 + $0x20] sm:$0xff] }
  0x97   : > { %600 = vmatpush2.msra.mxu1 %v541_v23  ;;  %883 = vmatprep.subr.mxu0 %v667_v48  ;;  %v392_v11 = vrot.slane %v387_v9, %v391_v8  ;;  %v396_v12 = vrot.slane %v387_v9, %v395_v10  ;;  %v655_v23 = vld [vmem:[#allocation8 + $0x98] sm:$0xff] }
  0x98   : > { %601 = vmatprep.subr.mxu1 %v540_v24  ;;  %884 = vmatpush3.msra.mxu0 %v651_v49  ;;  %v639_v24 = vld [vmem:[#allocation8 + $0x18] sm:$0xff] }
  0x99   : > { %602 = vmatpush2.msra.mxu1 %v539_v25  ;;  %885 = vmatprep.subr.mxu0 %v666_v50  ;;  %v654_v25 = vld [vmem:[#allocation8 + $0x90] sm:$0xff] }
  0x9a   : > { %603 = vmatprep.subr.mxu1 %v538_v26  ;;  %886 = vmatpush3.msra.mxu0 %v650_v51  ;;  %v638_v26 = vld [vmem:[#allocation8 + $0x10] sm:$0xff] }
  0x9b   : > { %604 = vmatpush2.msra.mxu1 %v537_v27  ;;  %887 = vmatprep.subr.mxu0 %v665_v52  ;;  %v653_v27 = vld [vmem:[#allocation8 + $0x88] sm:$0xff] }
  0x9c   : > { %605 = vmatprep.subr.mxu1 %v536_v28  ;;  %888 = vmatpush3.msra.mxu0 %v649_v53  ;;  %v637_v28 = vld [vmem:[#allocation8 + $0x8] sm:$0xff] }
  0x9d   : > { %606 = vmatpush2.msra.mxu1 %v535_v29  ;;  %889 = vmatprep.subr.mxu0 %v664_v54  ;;  %v652_v29 = vld [vmem:[#allocation8 + $0x80] sm:$0xff] }
  0x9e   : > { %607 = vmatprep.subr.mxu1 %v534_v30  ;;  %890 = vmatpush3.msra.mxu0 %v648_v55  ;;  %v636_v30 = vld [vmem:[#allocation8] sm:$0xff] }
  0x9f   : > { %608 = vmatpush2.msra.mxu1 %v533_v31  ;;  %891 = vmatprep.subr.mxu0 %v663_v56  ;;  %v549_v31 = vld [vmem:[%s1421_s4] sm:$0x3] }
  0xa0   : > { %609 = vmatprep.subr.mxu1 %v532_v32  ;;  %892 = vmatpush3.msra.mxu0 %v647_v57  ;;  %v554_v32 = vrot.slane %v549_v31, %v391_v8 }
  0xa1   : > { %610 = vmatpush2.msra.mxu1 %v531_v33  ;;  %893 = vmatprep.subr.mxu0 %v662_v58  ;;  %v558_v33 = vrot.slane %v549_v31, %v395_v10 }
  0xa2   : > { %611 = vmatprep.subr.mxu1 %v530_v34  ;;  %894 = vmatpush3.msra.mxu0 %v646_v59 }
  0xa3   : > { %612 = vmatpush2.msra.mxu1 %v529_v35  ;;  %895 = vmatprep.subr.mxu0 %v661_v60 }
  0xa4   : > { %613 = vmatprep.subr.mxu1 %v528_v36  ;;  %896 = vmatpush3.msra.mxu0 %v645_v61 }
  0xa5   : > { %614 = vmatpush2.msra.mxu1 %v527_v37  ;;  %897 = vmatprep.subr.mxu0 %v660_v62 }
  0xa6   : > { %615 = vmatprep.subr.mxu1 %v526_v38  ;;  %898 = vmatpush3.msra.mxu0 %v644_v63 }
  0xa7   : > { %616 = vmatpush2.msra.mxu1 %v525_v39  ;;  %899 = vmatprep.subr.mxu0 %v659_v0 }
  0xa8   : > { %617 = vmatprep.subr.mxu1 %v524_v40  ;;  %900 = vmatpush3.msra.mxu0 %v643_v1 }
  0xa9   : > { %618 = vmatpush2.msra.mxu1 %v523_v41  ;;  %901 = vmatprep.subr.mxu0 %v658_v2 }
  0xaa   : > { %619 = vmatprep.subr.mxu1 %v522_v42  ;;  %902 = vmatpush3.msra.mxu0 %v642_v3 }
  0xab   : > { %620 = vmatpush2.msra.mxu1 %v521_v43  ;;  %903 = vmatprep.subr.mxu0 %v657_v4  ;;  %v877_v43 = vld [vmem:[%s1423_s6] ss:$0 sm:$0xff] }
  0xac   : > { %621 = vmatprep.subr.mxu1 %v520_v44  ;;  %904 = vmatpush3.msra.mxu0 %v641_v5 }
  0xad   : > { %622 = vmatpush2.msra.mxu1 %v519_v45  ;;  %905 = vmatprep.subr.mxu0 %v656_v21 }
  0xae   : > { %623 = vmatprep.subr.mxu1 %v518_v46  ;;  %906 = vmatpush3.msra.mxu0 %v640_v22 }
  0xaf   : > { %624 = vmatpush2.msra.mxu1 %v517_v47  ;;  %907 = vmatprep.subr.mxu0 %v655_v23 }
  0xb0   : > { %908 = vmatpush3.msra.mxu0 %v639_v24 }
  0xb1   : > { %909 = vmatprep.subr.mxu0 %v654_v25 }
  0xb2   : > { %910 = vmatpush3.msra.mxu0 %v638_v26 }
  0xb3   : > { %911 = vmatprep.subr.mxu0 %v653_v27 }
  0xb4   : > { %912 = vmatpush3.msra.mxu0 %v637_v28 }
  0xb5   : > { %913 = vmatprep.subr.mxu0 %v652_v29 }
  0xb6   : > { %914 = vmatpush3.msra.mxu0 %v636_v30 }
 0x156   : > { %v476_v13 = vpop.f32.mrf.mxu0 }
 0x157   : > { %v477_v14 = vadd.f32 %v476_v13, %v392_v11 }
 0x158   : > { %v478_v15 = vpop.f32.mrf.mxu0 }
 0x159   : > { %v479_v16 = vadd.f32 %v478_v15, %v396_v12  ;;  %v481_v17 = vmul.f32 0.01, %v477_v14 }
 0x15b   : > { %v482_v18 = vmul.f32 0.01, %v479_v16  ;;  %v483_v20 = vmax.f32 %v477_v14, %v481_v17 }
 0x15d   : > { %v484_v19 = vmax.f32 %v479_v16, %v482_v18 }
 0x15f   : > { %625 = vmatprep.mubr.f32.mxu1 %v484_v19 }
 0x160   : > { %626 = vmatmul.mubr.f32.vlgmr.msra.gmra.mxu1 %v483_v20 }
 0x220   : > { %v627_v34 = vpop.f32.mrf.mxu1 }
 0x221   : > { %v628_v35 = vadd.f32 %v627_v34, %v554_v32 }
 0x222   : > { %v629_v36 = vpop.f32.mrf.mxu1 }
 0x223   : > { %v630_v37 = vadd.f32 %v629_v36, %v558_v33  ;;  %v632_v38 = vmul.f32 0.01, %v628_v35 }
 0x225   : > { %v633_v39 = vmul.f32 0.01, %v630_v37  ;;  %v634_v41 = vmax.f32 %v628_v35, %v632_v38 }
 0x227   : > { %v635_v40 = vmax.f32 %v630_v37, %v633_v39 }
 0x229   : > { %739 = vmatprep.mubr.f32.mxu0 %v635_v40 }
 0x22a   : > { %740 = vmatmul.mubr.f32.vlgmr.msra.gmra.mxu0 %v634_v41 }
 0x2ea   : > { %v915_v42 = vpop.f32.mrf.mxu0 }
 0x2ec   : > { %v916_v44 = vpop.f32.mrf.mxu0 }
 0x2ed   : > { %v917_v45 = vadd.f32 %v916_v44, %v915_v42 }
 0x2ef   : > { %v742_v46 = vadd.f32 %v917_v45, %v877_v43 }
 0x2f1   : > { %745 = vst [vmem:[%s338_s29] sm:$0xff] %v742_v46 }
 0x2f2   : > { %1118 = shalt.err (!%p1115_p9)
}
 0x2f3   : > { %s1119_s9 = scalar_lea.hbm %s758_s19, 128  ;;  %s1123_s13 = scalar_lea.hbm %s1424_s7, 384 }
 0x2f4   : > { %p1120_p12 = scmp.ne.s32.totalorder %s758_s19, %s1119_s9  ;;  %p1124_p5 = scmp.lt.s32.totalorder %s758_s19, %s1424_s7 }
 0x2f5   : > { %p1125_p10 = scmp.lt.s32.totalorder %s1123_s13, %s1119_s9 }
 0x2f6   : > { %p1121_p1 = pnand %p1120_p12, %p1446_p6 }
 0x2f7   : > { %p1126_p2 = por %p1125_p10, %p1124_p5 }
 0x2f8   : > { %p1122_p8 = pneg %p1121_p1 }
 0x2fa   : > { %p1127_p4 = pnand %p1126_p2, %p1122_p8 }
 0x2fc   : > { %1130 = shalt.err (!%p1127_p4)
}
 0x2fd   : > { %932 = dma.vmem_to_hbm [thread:$0]  (%p1446_p6), %s761_s16, 128, %s758_s19, %s747_s22  }
 0x2fe PF: > { %p959_p11 = scmp.ge.s32.totalorder %s1177_s27, 2  ;;  %s772_s23 = sand.u32 1, %s1165_s24  }
 0x2ff   : > { %p1447_p13 = scmp.ne.s32.totalorder %s1432_s8, 0  ;;  %s773_s29 = scalar_lea.sflag [#allocation4], %s772_s23 }
 0x301   : > { %p949_p3 = pnand %p959_p11, %p1447_p13 }
 0x303   : > { %p950_p0 = pneg %p949_p3 }
 0x305   : > { %1160 = dma.done.wait (%p950_p0), %s773_s29, 128  }
 0x306   : > { %1162 = vsyncadd (%p950_p0), %s773_s29, 4294967168  ;;  %p22_p7 = scmp.ge.s32.totalorder %s1307_s17, 5   ;;  %s1448_s24 = smov %s1169_s25 }
 0x307   : > { %s1449_s25 = smov %s1173_s26  ;;  %s1450_s26 = smov %s1317_s20 }
 0x308   : > { %s1451_s27 = smov %s1307_s17  ;;  %24 = sbr.rel (!%p22_p7) target bundleno = 10 (0xa), region = 105 }
 0x30d   :  { %778 = vsyncpa [#allocation3], 1 }
 0x30e   :  { %780 = vsyncpa [#allocation3 + $0x1], 1 }
 0x30f   :  { %781 = vsyncpa [#allocation6], 1 }
 0x310   :  { %782 = vsyncpa [#allocation9], 1 }
 0x311   :  { %783 = vsyncpa [#allocation4], 1 }
 0x312   :  { %785 = vsyncpa [#allocation4 + $0x1], 1 }

</bundles_post_ra>
